<compile_context>
chip_gen: v5e
topology: v5e:2x2
jax: 0.10.0
libtpu: 0.0.40
codegen_flags: <defaults>
</compile_context>

<pallas_src>
import functools

import jax
import jax.numpy as jnp
from jax import lax
from jax.experimental import pallas as pl
from jax.experimental.pallas import tpu as pltpu

LN_EPS = 1e-5  # torch.nn.LayerNorm default


def _layblock_cnn_kernel(x_ref, g_ref, b_ref, w_ref, cb_ref, out_ref, zcnt_ref,
                         *, seq_len):
    """Fused: LayerNorm -> zero-padded conv1d (K tap matmuls) -> ReLU -> zeroes -> residual.

    x_ref   : [R, F]     R = block_batch*seq_len flattened rows (x dtype)
    g_ref   : [1, F]     LayerNorm gamma (f32)
    b_ref   : [1, F]     LayerNorm beta  (f32)
    w_ref   : [K, F, F]  conv taps (bf16); w_ref[k, i, o] == torch_conv_w[o, i, k]
    cb_ref  : [1, F]     conv bias (f32)
    out_ref : [R, F]     block output (post residual), x dtype
    zcnt_ref: [1, 1, F]  per-block count of activated (>0) units per feature (f32)
    """
    R, F = x_ref.shape
    K = w_ref.shape[0]
    P = (K - 1) // 2
    S = seq_len

    x = x_ref[...].astype(jnp.float32)

    # ---- LayerNorm over features; single-pass statistics (f32)
    mean = jnp.mean(x, axis=-1, keepdims=True)
    mean_sq = jnp.mean(x * x, axis=-1, keepdims=True)
    var = mean_sq - mean * mean
    xn = (x - mean) * lax.rsqrt(var + LN_EPS)
    xn = xn * g_ref[...] + b_ref[...]

    # position of each row inside its own sequence; the mask below reproduces the
    # 'padded=True' zero padding AND stops cross-sequence leakage from the roll
    # (each block holds whole sequences, so block edges are sequence edges).
    tpos = lax.broadcasted_iota(jnp.int32, (R, 1), 0) % S

    # ---- K accumulating depth-F tap matmuls (bf16 operands, f32 MXU accumulate)
    acc = jnp.broadcast_to(cb_ref[...], (R, F))        # start from the conv bias
    for k in range(K):
        d = k - P                                       # output[t] consumes xn[t + d]
        if d == 0:
            xs = xn
        else:
            xs = pltpu.roll(xn, (-d) % R, 0)            # XLU sublane rotate (otherwise idle)
            valid = (tpos + d >= 0) & (tpos + d < S)
            xs = jnp.where(valid, xs, 0.0)              # zero-padding semantics
        acc = acc + jnp.dot(xs.astype(jnp.bfloat16), w_ref[k],
                            preferred_element_type=jnp.float32)

    # ---- activation (ReLU)
    y = jnp.maximum(acc, 0.0)

    # ---- torchness zeroes(): per-block activated counts; wrapper finishes the mean.
    cnt = jnp.sum((y > 0.0).astype(jnp.float32), axis=0, keepdims=True)   # [1, F]
    zcnt_ref[...] = cnt.reshape(1, 1, F)

    # ---- LayRES (dropout=0, same width): residual add of the ORIGINAL input in
    # f32; cast only on the final store (out dtype == x dtype).
    out_ref[...] = (y + x).astype(out_ref.dtype)


def _pick_block_batch(B, S, F, itemsize, vmem_cap):
    """Largest whole-sequence batch tile whose f32 activation block fits the target,
    keeping >= 2 grid steps when B allows (pipelining; v7x dual TensorCores)."""
    # one f32 [blk*S, F] block; the in-kernel working set is ~10-13x this.
    target_blk_bytes = max(512 * 1024, min(8 * 2**20, vmem_cap // 20))
    sub = 8 if itemsize >= 4 else 16                    # sublane tile of the in/out dtype
    divisors = [d for d in range(1, B + 1) if B % d == 0]
    legal = [d for d in divisors if (d * S) % sub == 0] or [B]   # d == B -> full array, always legal
    cands = [d for d in legal if B // d >= 2] or legal
    fitting = [d for d in cands if d * S * F * 4 <= target_blk_bytes]
    return max(fitting) if fitting else min(cands)


def lay_block_cnn(x, ln_gamma, ln_beta, conv_w, conv_b, kernel_size=3,
                  block_batch=None):
    """Pallas forward of LayBlockCNN (defaults; history=None, do_ldrt=False).

    x       : [B, S, F]
    conv_w  : [F_out, F_in, K]  (PyTorch Conv1d weight layout)
    conv_b  : [F_out]
    returns dict {'out': [B,S,F] (x.dtype), 'state': None, 'zeroes': [F] f32}
    """
    B, S, F = x.shape
    K = kernel_size
    assert K % 2 == 1, "LayBlockCNN kernel_size cannot be even"
    assert conv_w.shape == (F, F, K)
    assert F % 128 == 0, "F is kept lane-dense (multiple of 128)"

    itemsize = jnp.dtype(x.dtype).itemsize

    # generation-aware VMEM capacity (64 MiB/TC on v7x, 128 MiB on v5e/v6e)
    try:
        vmem_cap = int(pltpu.get_tpu_info().vmem_capacity_bytes)
    except Exception:
        vmem_cap = 64 * 2**20

    if block_batch is None:
        block_batch = _pick_block_batch(B, S, F, itemsize, vmem_cap)
    blk = block_batch
    assert B % blk == 0, "block_batch must divide B"
    nbt = B // blk
    R = blk * S                                          # rows per grid step

    # tiny host-side parameter re-layout (no activation-sized HBM copies)
    w_taps = jnp.transpose(conv_w, (2, 1, 0)).astype(jnp.bfloat16)   # [K, F_in, F_out]
    gamma = ln_gamma.reshape(1, F).astype(jnp.float32)
    beta = ln_beta.reshape(1, F).astype(jnp.float32)
    bias = conv_b.reshape(1, F).astype(jnp.float32)

    x2 = x.reshape(B * S, F)                             # free contiguous reshape (XLA side)

    cost = pl.CostEstimate(
        flops=int(2 * B * S * K * F * F),
        transcendentals=int(B * S),                      # one rsqrt per row
        bytes_accessed=int(2 * B * S * F * itemsize      # x in + out (same dtype)
                           + K * F * F * 2 + 3 * F * 4 + nbt * F * 4),
    )

    # VMEM budget: double-buffered in/out blocks (x dtype) + f32 in-kernel temps
    # (x, xn, shifted tap, acc, y, slack) + double-buffered params + headroom.
    # NOTE: the grid-invariant params are tiny at F=128; at F>=1024 single-buffer
    # them (pipeline_mode) before scaling, esp. under v7x's 64 MiB VMEM.
    blk_f32 = R * F * 4
    work = (4 * R * F * itemsize + 9 * blk_f32
            + 4 * K * F * F * 2 + 8 * F * 4 + (2 << 20))
    vmem_limit = int(min(int(0.85 * vmem_cap), max(32 * 2**20, work)))
    # TODO(synk): for small-B / very long-S shapes an S-tile grid axis with a
    # (K-1)-row halo is needed to bound VMEM and keep the grid >= 2 steps; the
    # default config/shapes here do not require it.

    kernel = functools.partial(_layblock_cnn_kernel, seq_len=S)

    out2, z_counts = pl.pallas_call(
        kernel,
        grid=(nbt,),
        in_specs=[
            pl.BlockSpec((R, F), lambda i: (i, 0)),          # x rows
            pl.BlockSpec((1, F), lambda i: (0, 0)),          # gamma
            pl.BlockSpec((1, F), lambda i: (0, 0)),          # beta
            pl.BlockSpec((K, F, F), lambda i: (0, 0, 0)),    # conv taps
            pl.BlockSpec((1, F), lambda i: (0, 0)),          # conv bias
        ],
        out_specs=(
            pl.BlockSpec((R, F), lambda i: (i, 0)),
            pl.BlockSpec((1, 1, F), lambda i: (i, 0, 0)),
        ),
        out_shape=(
            jax.ShapeDtypeStruct((B * S, F), x.dtype),       # out in x.dtype
            jax.ShapeDtypeStruct((nbt, 1, F), jnp.float32),  # per-tile activation counts
        ),
        compiler_params=pltpu.CompilerParams(
            dimension_semantics=("parallel",),
            vmem_limit_bytes=vmem_limit,
        ),
        cost_estimate=cost,
    )(x2, gamma, beta, w_taps, bias)

    out = out2.reshape(B, S, F)
    zeroes = 1.0 - jnp.sum(z_counts, axis=(0, 1)) / float(B * S)

    # TODO(synk): causal history/state path (history is not None) and the optional
    # LayBlockDRT tail (do_ldrt=True) are not exercised by the default config.
    return {"out": out, "state": None, "zeroes": zeroes}


def _reference(x, ln_gamma, ln_beta, conv_w, conv_b, kernel_size=3):
    """Pure-JAX reference (mirrors the kernel's bf16 MXU operands, f32 accumulate)."""
    B, S, F = x.shape
    K = kernel_size
    P = (K - 1) // 2
    xf = x.astype(jnp.float32)
    mean = xf.mean(-1, keepdims=True)
    var = ((xf - mean) ** 2).mean(-1, keepdims=True)
    xn = (xf - mean) * lax.rsqrt(var + LN_EPS) * ln_gamma + ln_beta
    xp = jnp.pad(xn, ((0, 0), (P, P), (0, 0))).astype(jnp.bfloat16)
    w = conv_w.astype(jnp.bfloat16)
    acc = jnp.zeros((B, S, F), jnp.float32)
    for k in range(K):
        acc = acc + jnp.einsum("bsi,oi->bso", xp[:, k:k + S, :], w[:, :, k],
                               preferred_element_type=jnp.float32)
    acc = acc + conv_b
    y = jnp.maximum(acc, 0.0)
    zer = 1.0 - (y > 0).astype(jnp.float32).mean(axis=(0, 1))
    return y + xf, zer


if __name__ == "__main__":
    B, S, F, K = 4, 16, 128, 3   # small, but lane-dense (F multiple of 128)

    key = jax.random.PRNGKey(0)
    kx, kw, kb, kg, kbeta = jax.random.split(key, 5)
    x = jax.random.normal(kx, (B, S, F), jnp.float32)

    ln_gamma = 1.0 + 0.1 * jax.random.normal(kg, (F,), jnp.float32)
    ln_beta = 0.1 * jax.random.normal(kbeta, (F,), jnp.float32)
    conv_w = 0.1 * jax.random.normal(kw, (F, F, K), jnp.float32)   # [out, in, K]
    conv_b = 0.05 * jax.random.normal(kb, (F,), jnp.float32)

    # f32 path (heuristic picks block_batch=2 -> 2 pipelined "parallel" grid steps)
    res = lay_block_cnn(x, ln_gamma, ln_beta, conv_w, conv_b, kernel_size=K)
    out = jax.block_until_ready(res["out"])
    zer = jax.block_until_ready(res["zeroes"])

    ref_out, ref_zer = _reference(x, ln_gamma, ln_beta, conv_w, conv_b, K)
    assert out.shape == (B, S, F) and out.dtype == x.dtype
    assert zer.shape == (F,)
    assert res["state"] is None
    assert jnp.allclose(out, ref_out, atol=2e-3, rtol=2e-3), "out mismatch (f32)"
    assert jnp.allclose(zer, ref_zer, atol=2e-2), "zeroes mismatch (f32)"

    # bf16 path: output is emitted in the input dtype (halved writeback traffic)
    xb = x.astype(jnp.bfloat16)
    res_b = lay_block_cnn(xb, ln_gamma, ln_beta, conv_w, conv_b, kernel_size=K)
    out_b = jax.block_until_ready(res_b["out"])
    assert out_b.dtype == jnp.bfloat16 and out_b.shape == (B, S, F)
    assert jnp.allclose(out_b.astype(jnp.float32), ref_out, atol=1e-1, rtol=1e-1), \
        "out mismatch (bf16)"

    print("KERNEL_OK")
</pallas_src>

<mosaic_0001>
module attributes {stable_mosaic.version = 11 : i64} {
  func.func @_layblock_cnn_kernel(%arg0: i32, %arg1: memref<32x128xf32, #tpu.memory_space<vmem>>, %arg2: memref<1x128xf32, #tpu.memory_space<vmem>>, %arg3: memref<1x128xf32, #tpu.memory_space<vmem>>, %arg4: memref<3x128x128xbf16, #tpu.memory_space<vmem>>, %arg5: memref<1x128xf32, #tpu.memory_space<vmem>>, %arg6: memref<32x128xf32, #tpu.memory_space<vmem>>, %arg7: memref<1x1x128xf32, #tpu.memory_space<vmem>>) attributes {dimension_semantics = [#tpu.dimension_semantics<parallel>], iteration_bounds = array<i64: 2>, scalar_prefetch = 0 : i64, scratch_operands = 0 : i64, tpu.core_type = #tpu.core_type<tc>, window_params = [{transform_indices = @transform_0, window_bounds = array<i64: 32, 128>}, {pipeline_mode = #tpu.pipeline_mode<synchronous>, transform_indices = @transform_1, window_bounds = array<i64: 1, 128>}, {pipeline_mode = #tpu.pipeline_mode<synchronous>, transform_indices = @transform_2, window_bounds = array<i64: 1, 128>}, {pipeline_mode = #tpu.pipeline_mode<synchronous>, transform_indices = @transform_3, window_bounds = array<i64: 3, 128, 128>}, {pipeline_mode = #tpu.pipeline_mode<synchronous>, transform_indices = @transform_4, window_bounds = array<i64: 1, 128>}, {transform_indices = @transform_5, window_bounds = array<i64: 32, 128>}, {transform_indices = @transform_6, window_bounds = array<i64: 1, 1, 128>}]} {
    %c0 = arith.constant 0 : index
    %c0_0 = arith.constant 0 : index
    %0 = vector.load %arg1[%c0, %c0_0] : memref<32x128xf32, #tpu.memory_space<vmem>>, vector<32x128xf32>
    %cst = arith.constant dense<0.000000e+00> : vector<32xf32>
    %1 = vector.multi_reduction <add>, %0, %cst [1] : vector<32x128xf32> to vector<32xf32>
    %2 = vector.shape_cast %1 : vector<32xf32> to vector<32x1xf32>
    %cst_1 = arith.constant 1.280000e+02 : f32
    %3 = vector.broadcast %cst_1 : f32 to vector<32x1xf32>
    %4 = arith.divf %2, %3 : vector<32x1xf32>
    %5 = arith.mulf %0, %0 : vector<32x128xf32>
    %cst_2 = arith.constant dense<0.000000e+00> : vector<32xf32>
    %6 = vector.multi_reduction <add>, %5, %cst_2 [1] : vector<32x128xf32> to vector<32xf32>
    %7 = vector.shape_cast %6 : vector<32xf32> to vector<32x1xf32>
    %cst_3 = arith.constant 1.280000e+02 : f32
    %8 = vector.broadcast %cst_3 : f32 to vector<32x1xf32>
    %9 = arith.divf %7, %8 : vector<32x1xf32>
    %10 = arith.mulf %4, %4 : vector<32x1xf32>
    %11 = arith.subf %9, %10 : vector<32x1xf32>
    %12 = vector.broadcast %4 : vector<32x1xf32> to vector<32x128xf32>
    %13 = arith.subf %0, %12 : vector<32x128xf32>
    %cst_4 = arith.constant 9.99999974E-6 : f32
    %14 = vector.broadcast %cst_4 : f32 to vector<32x1xf32>
    %15 = arith.addf %11, %14 : vector<32x1xf32>
    %16 = math.rsqrt %15 : vector<32x1xf32>
    %17 = vector.broadcast %16 : vector<32x1xf32> to vector<32x128xf32>
    %18 = arith.mulf %13, %17 : vector<32x128xf32>
    %c0_5 = arith.constant 0 : index
    %c0_6 = arith.constant 0 : index
    %19 = vector.load %arg2[%c0_5, %c0_6] : memref<1x128xf32, #tpu.memory_space<vmem>>, vector<1x128xf32>
    %20 = vector.broadcast %19 : vector<1x128xf32> to vector<32x128xf32>
    %21 = arith.mulf %18, %20 : vector<32x128xf32>
    %c0_7 = arith.constant 0 : index
    %c0_8 = arith.constant 0 : index
    %22 = vector.load %arg3[%c0_7, %c0_8] : memref<1x128xf32, #tpu.memory_space<vmem>>, vector<1x128xf32>
    %23 = vector.broadcast %22 : vector<1x128xf32> to vector<32x128xf32>
    %24 = arith.addf %21, %23 : vector<32x128xf32>
    %25 = tpu.iota {dimensions = array<i32: 0>} : vector<32x1xi32>
    %c16_i32 = arith.constant 16 : i32
    %c0_i32 = arith.constant 0 : i32
    %26 = arith.cmpi eq, %c16_i32, %c0_i32 : i32
    %c1_i32 = arith.constant 1 : i32
    %27 = arith.select %26, %c1_i32, %c16_i32 : i32
    %28 = vector.broadcast %27 : i32 to vector<32x1xi32>
    %29 = arith.remsi %25, %28 : vector<32x1xi32>
    %c0_i32_9 = arith.constant 0 : i32
    %30 = vector.broadcast %c0_i32_9 : i32 to vector<32x1xi32>
    %31 = arith.cmpi ne, %29, %30 : vector<32x1xi32>
    %c0_i32_10 = arith.constant 0 : i32
    %32 = vector.broadcast %c0_i32_10 : i32 to vector<32x1xi32>
    %33 = arith.cmpi slt, %29, %32 : vector<32x1xi32>
    %c0_i32_11 = arith.constant 0 : i32
    %34 = arith.cmpi slt, %27, %c0_i32_11 : i32
    %35 = vector.broadcast %34 : i1 to vector<32x1xi1>
    %36 = vector.broadcast %35 : vector<32x1xi1> to vector<32x1xi1>
    %37 = arith.xori %33, %36 : vector<32x1xi1>
    %38 = arith.andi %37, %31 : vector<32x1xi1>
    %39 = vector.broadcast %27 : i32 to vector<32x1xi32>
    %40 = arith.addi %29, %39 : vector<32x1xi32>
    %41 = arith.select %38, %40, %29 : vector<32x1xi1>, vector<32x1xi32>
    %c0_12 = arith.constant 0 : index
    %c0_13 = arith.constant 0 : index
    %42 = vector.load %arg5[%c0_12, %c0_13] : memref<1x128xf32, #tpu.memory_space<vmem>>, vector<1x128xf32>
    %43 = vector.shape_cast %42 : vector<1x128xf32> to vector<1x128xf32>
    %44 = vector.broadcast %43 : vector<1x128xf32> to vector<32x128xf32>
    %c1_i32_14 = arith.constant 1 : i32
    %45 = tpu.dynamic_rotate %24 by %c1_i32_14 dim 0 : vector<32x128xf32>, i32 -> vector<32x128xf32>
    %c-1_i32 = arith.constant -1 : i32
    %46 = vector.broadcast %c-1_i32 : i32 to vector<32x1xi32>
    %47 = arith.addi %41, %46 : vector<32x1xi32>
    %c0_i32_15 = arith.constant 0 : i32
    %48 = vector.broadcast %c0_i32_15 : i32 to vector<32x1xi32>
    %49 = arith.cmpi sge, %47, %48 : vector<32x1xi32>
    %c-1_i32_16 = arith.constant -1 : i32
    %50 = vector.broadcast %c-1_i32_16 : i32 to vector<32x1xi32>
    %51 = arith.addi %41, %50 : vector<32x1xi32>
    %c16_i32_17 = arith.constant 16 : i32
    %52 = vector.broadcast %c16_i32_17 : i32 to vector<32x1xi32>
    %53 = arith.cmpi slt, %51, %52 : vector<32x1xi32>
    %54 = arith.andi %49, %53 : vector<32x1xi1>
    %cst_18 = arith.constant 0.000000e+00 : f32
    %55 = vector.shape_cast %54 : vector<32x1xi1> to vector<32x1xi1>
    %56 = vector.broadcast %55 : vector<32x1xi1> to vector<32x128xi1>
    %57 = vector.broadcast %cst_18 : f32 to vector<32x128xf32>
    %58 = arith.select %56, %45, %57 : vector<32x128xi1>, vector<32x128xf32>
    %59 = arith.truncf %58 : vector<32x128xf32> to vector<32x128xbf16>
    %c0_19 = arith.constant 0 : index
    %c0_20 = arith.constant 0 : index
    %c0_21 = arith.constant 0 : index
    %60 = vector.load %arg4[%c0_19, %c0_20, %c0_21] : memref<3x128x128xbf16, #tpu.memory_space<vmem>>, vector<1x128x128xbf16>
    %61 = vector.shape_cast %60 : vector<1x128x128xbf16> to vector<128x128xbf16>
    %cst_22 = arith.constant dense<0.000000e+00> : vector<32x128xf32>
    %62 = tpu.matmul %59, %61, %cst_22 {dimension_numbers = #tpu.dot_dimension_numbers<[1], [0], [0], [1], [0, 0, 1, 1], [], []>} : vector<32x128xbf16>, vector<128x128xbf16>, vector<32x128xf32> -> vector<32x128xf32>
    %63 = arith.addf %44, %62 : vector<32x128xf32>
    %64 = arith.truncf %24 : vector<32x128xf32> to vector<32x128xbf16>
    %c1 = arith.constant 1 : index
    %c0_23 = arith.constant 0 : index
    %c0_24 = arith.constant 0 : index
    %65 = vector.load %arg4[%c1, %c0_23, %c0_24] : memref<3x128x128xbf16, #tpu.memory_space<vmem>>, vector<1x128x128xbf16>
    %66 = vector.shape_cast %65 : vector<1x128x128xbf16> to vector<128x128xbf16>
    %cst_25 = arith.constant dense<0.000000e+00> : vector<32x128xf32>
    %67 = tpu.matmul %64, %66, %cst_25 {dimension_numbers = #tpu.dot_dimension_numbers<[1], [0], [0], [1], [0, 0, 1, 1], [], []>} : vector<32x128xbf16>, vector<128x128xbf16>, vector<32x128xf32> -> vector<32x128xf32>
    %68 = arith.addf %63, %67 : vector<32x128xf32>
    %c31_i32 = arith.constant 31 : i32
    %69 = tpu.dynamic_rotate %24 by %c31_i32 dim 0 : vector<32x128xf32>, i32 -> vector<32x128xf32>
    %c1_i32_26 = arith.constant 1 : i32
    %70 = vector.broadcast %c1_i32_26 : i32 to vector<32x1xi32>
    %71 = arith.addi %41, %70 : vector<32x1xi32>
    %c0_i32_27 = arith.constant 0 : i32
    %72 = vector.broadcast %c0_i32_27 : i32 to vector<32x1xi32>
    %73 = arith.cmpi sge, %71, %72 : vector<32x1xi32>
    %c1_i32_28 = arith.constant 1 : i32
    %74 = vector.broadcast %c1_i32_28 : i32 to vector<32x1xi32>
    %75 = arith.addi %41, %74 : vector<32x1xi32>
    %c16_i32_29 = arith.constant 16 : i32
    %76 = vector.broadcast %c16_i32_29 : i32 to vector<32x1xi32>
    %77 = arith.cmpi slt, %75, %76 : vector<32x1xi32>
    %78 = arith.andi %73, %77 : vector<32x1xi1>
    %cst_30 = arith.constant 0.000000e+00 : f32
    %79 = vector.shape_cast %78 : vector<32x1xi1> to vector<32x1xi1>
    %80 = vector.broadcast %79 : vector<32x1xi1> to vector<32x128xi1>
    %81 = vector.broadcast %cst_30 : f32 to vector<32x128xf32>
    %82 = arith.select %80, %69, %81 : vector<32x128xi1>, vector<32x128xf32>
    %83 = arith.truncf %82 : vector<32x128xf32> to vector<32x128xbf16>
    %c2 = arith.constant 2 : index
    %c0_31 = arith.constant 0 : index
    %c0_32 = arith.constant 0 : index
    %84 = vector.load %arg4[%c2, %c0_31, %c0_32] : memref<3x128x128xbf16, #tpu.memory_space<vmem>>, vector<1x128x128xbf16>
    %85 = vector.shape_cast %84 : vector<1x128x128xbf16> to vector<128x128xbf16>
    %cst_33 = arith.constant dense<0.000000e+00> : vector<32x128xf32>
    %86 = tpu.matmul %83, %85, %cst_33 {dimension_numbers = #tpu.dot_dimension_numbers<[1], [0], [0], [1], [0, 0, 1, 1], [], []>} : vector<32x128xbf16>, vector<128x128xbf16>, vector<32x128xf32> -> vector<32x128xf32>
    %87 = arith.addf %68, %86 : vector<32x128xf32>
    %cst_34 = arith.constant 0.000000e+00 : f32
    %88 = vector.broadcast %cst_34 : f32 to vector<32x128xf32>
    %89 = arith.maximumf %87, %88 : vector<32x128xf32>
    %cst_35 = arith.constant 0.000000e+00 : f32
    %90 = vector.broadcast %cst_35 : f32 to vector<32x128xf32>
    %91 = arith.cmpf ogt, %89, %90 : vector<32x128xf32>
    %92 = arith.extui %91 : vector<32x128xi1> to vector<32x128xi32>
    %93 = arith.sitofp %92 : vector<32x128xi32> to vector<32x128xf32>
    %cst_36 = arith.constant dense<0.000000e+00> : vector<128xf32>
    %94 = vector.multi_reduction <add>, %93, %cst_36 [0] : vector<32x128xf32> to vector<128xf32>
    %95 = vector.shape_cast %94 : vector<128xf32> to vector<1x128xf32>
    %96 = vector.shape_cast %95 : vector<1x128xf32> to vector<1x1x128xf32>
    %c0_37 = arith.constant 0 : index
    %c0_38 = arith.constant 0 : index
    %c0_39 = arith.constant 0 : index
    %97 = vector.load %arg7[%c0_37, %c0_38, %c0_39] : memref<1x1x128xf32, #tpu.memory_space<vmem>>, vector<1x1x128xf32>
    tpu.vector_store %arg7[%c0_37, %c0_38, %c0_39], %96 {strides = array<i32>} : memref<1x1x128xf32, #tpu.memory_space<vmem>>, vector<1x1x128xf32>,
    %98 = arith.addf %89, %0 : vector<32x128xf32>
    %c0_40 = arith.constant 0 : index
    %c0_41 = arith.constant 0 : index
    %99 = vector.load %arg6[%c0_40, %c0_41] : memref<32x128xf32, #tpu.memory_space<vmem>>, vector<32x128xf32>
    tpu.vector_store %arg6[%c0_40, %c0_41], %98 {strides = array<i32>} : memref<32x128xf32, #tpu.memory_space<vmem>>, vector<32x128xf32>,
    return
  }
  func.func @transform_0(%arg0: i32) -> (i32, i32) {
    %c0_i32 = arith.constant 0 : i32
    %c0_i32_0 = arith.constant 0 : i32
    return %arg0, %c0_i32 : i32, i32
  }
  func.func @transform_1(%arg0: i32) -> (i32, i32) {
    %c0_i32 = arith.constant 0 : i32
    %c0_i32_0 = arith.constant 0 : i32
    %c0_i32_1 = arith.constant 0 : i32
    return %c0_i32, %c0_i32_0 : i32, i32
  }
  func.func @transform_2(%arg0: i32) -> (i32, i32) {
    %c0_i32 = arith.constant 0 : i32
    %c0_i32_0 = arith.constant 0 : i32
    %c0_i32_1 = arith.constant 0 : i32
    return %c0_i32, %c0_i32_0 : i32, i32
  }
  func.func @transform_3(%arg0: i32) -> (i32, i32, i32) {
    %c0_i32 = arith.constant 0 : i32
    %c0_i32_0 = arith.constant 0 : i32
    %c0_i32_1 = arith.constant 0 : i32
    %c0_i32_2 = arith.constant 0 : i32
    return %c0_i32, %c0_i32_0, %c0_i32_1 : i32, i32, i32
  }
  func.func @transform_4(%arg0: i32) -> (i32, i32) {
    %c0_i32 = arith.constant 0 : i32
    %c0_i32_0 = arith.constant 0 : i32
    %c0_i32_1 = arith.constant 0 : i32
    return %c0_i32, %c0_i32_0 : i32, i32
  }
  func.func @transform_5(%arg0: i32) -> (i32, i32) {
    %c0_i32 = arith.constant 0 : i32
    %c0_i32_0 = arith.constant 0 : i32
    return %arg0, %c0_i32 : i32, i32
  }
  func.func @transform_6(%arg0: i32) -> (i32, i32, i32) {
    %c0_i32 = arith.constant 0 : i32
    %c0_i32_0 = arith.constant 0 : i32
    %c0_i32_1 = arith.constant 0 : i32
    return %arg0, %c0_i32, %c0_i32_0 : i32, i32, i32
  }
}

</mosaic_0001>

<bundles_post_ra>
// kernel: tpu_custom_call.1
= control target key start
LH: loop header
LB: loop body
LE: loop exit
PB: predicated region body
PF: predicated region fallthrough
CT: control target
= control target key end

     0   :  { %s1763_s0 = inlined_call_operand.hbm [shape: f32[64,128], index: 0, kind: input, shape index: {}]   ;;  %s1764_s1 = inlined_call_operand.hbm [shape: f32[1,128], index: 1, kind: input, shape index: {}]   ;;  %s1765_s2 = inlined_call_operand.vmem [shape: f32[1,128], index: 2, kind: input, shape index: {}]   ;;  %s1766_s3 = inlined_call_operand.hbm [shape: bf16[3,128,128], index: 3, kind: input, shape index: {}]   ;;  %s1767_s4 = inlined_call_operand.vmem [shape: f32[1,128], index: 4, kind: input, shape index: {}]   ;;  %s1768_s5 = inlined_call_operand.hbm [shape: f32[64,128], index: 5, kind: output, shape index: {0}]   ;;  %s1769_s6 = inlined_call_operand.hbm [shape: f32[2,1,128], index: 6, kind: output, shape index: {1}]  }
   0x1   :  { %1772 = sst [smem:[#allocation17_spill]] %s1764_s1 }
   0x2   :  { %1773 = sst [smem:[#allocation18_spill]] %s1766_s3 }
   0x3   :  { %12 = vsyncpa [#allocation3], 0 }
   0x4   :  { %14 = vsyncpa [#allocation3 + $0x1], 0 }
   0x5   :  { %15 = vsyncpa [#allocation6], 0 }
   0x6   :  { %16 = vsyncpa [#allocation4], 0 }
   0x7   :  { %18 = vsyncpa [#allocation4 + $0x1], 0 }
   0x8   :  { %19 = vsyncpa [#allocation10], 0 }
   0x9   :  { %21 = vsyncpa [#allocation10 + $0x1], 0  ;;  %s1515_s21 = smov 0   ;;  %s1517_s22 = smov 0  }
   0xa   :  { %s1519_s23 = smov 0   ;;  %s1521_s24 = smov 0  }
   0xb LB: > { %s1536_s25 = sadd.s32 4294967295, %s1467_s24   ;;  %s1017_s26 = sadd.s32 4294967294, %s1467_s24   ;;  %s1467_s24 = sphi %s1521_s24, %s1785_s24   ;;  %s1463_s23 = sphi %s1519_s23, %s1789_s23   ;;  %s1459_s22 = sphi %s1517_s22, %s1788_s22   ;;  %s1455_s21 = sphi %s1515_s21, %s1787_s21  }
   0xc   : > { %s1540_s27 = sadd.s32 1, %s1467_s24   ;;  %s34_s28 = sadd.s32 1, %s1463_s23 }
   0xd   : > { %1774 = sst [smem:[#allocation15_spill]] %s1540_s27  ;;  %s31_s29 = ssub.s32 %s1467_s24, %s1540_s27 }
   0xe   : > { %p41_p0 = scmp.ne.s32.totalorder %s1463_s23, %s1459_s22  ;;  %p32_p1 = scmp.eq.s32.totalorder %s31_s29, 0 }
   0xf   : > { %p42_p2 = scmp.eq.s32.totalorder %s1467_s24, 0  ;;  %p47_p3 = scmp.ne.s32.totalorder %s1459_s22, %s1455_s21 }
  0x10   : > { %p48_p4 = scmp.eq.s32.totalorder %s1536_s25, 0  ;;  %p155_p7 = scmp.eq.s32.totalorder %s1536_s25, 1 }
  0x11   : > { %s1552_s30 = scalar_select %p32_p1, %s1463_s23, %s34_s28  }
  0x12   : > { %p1554_p5 = por %p42_p2, %p41_p0  ;;  %p1560_p6 = por %p48_p4, %p47_p3 }
  0x13   : > { %1775 = sst [smem:[#allocation16_spill]] %s1552_s30  ;;  %p161_p8 = scmp.eq.s32.totalorder %s1017_s26, 1 }
  0x14   : > { %p1018_p9 = scmp.ge.s32.totalorder %s1467_s24, 1  ;;  %p194_p10 = scmp.lt.s32.totalorder %s1467_s24, 3 }
  0x15   : > { %p1567_p11 = por %p155_p7, %p41_p0  ;;  %p1571_p12 = por %p161_p8, %p47_p3 }
  0x16   : > { %p1575_p13 = pnand %p1018_p9, %p194_p10  ;;  %s1781_s1 = sld [smem:[#allocation17_spill]] }
  0x17   : > { %s1469_s15 = smov [#allocation5]   ;;  %p1215_p3 = scmp.lt.s32.totalorder %s1467_s24, 2 }
  0x18   : > { %p1195_p1 = pneg %p1575_p13  ;;  %s208_s16 = sshll.u32 %s1469_s15, 4  ;;  %s209_s16 = int_to_ptr.vmem [resolvable:$true] %s208_s16 }
  0x19   : > { %s1782_s3 = sld [smem:[#allocation18_spill]]  ;;  %p1593_p7 = pnand %p1215_p3, %p1554_p5 }
  0x1a   : > { %p1196_p2 = pnand %p1195_p1, %p48_p4  ;;  %s1470_s26 = smov [#allocation7]  }
  0x1b   : > { %s222_s28 = sshll.u32 %s1470_s26, 4  ;;  %s239_s29 = sand.u32 1, %s1463_s23   ;;  %s223_s28 = int_to_ptr.vmem [resolvable:$true] %s222_s28 }
  0x1c   : > { %s206_s14 = sshll.u32 %s1781_s1, 4  ;;  %s1471_s12 = smov 64   ;;  %s207_s14 = int_to_ptr.hbm [resolvable:$true] %s206_s14 }
  0x1d   : > { %1198 = dma.hbm_to_vmem [thread:$0]  (!%p1196_p2), %s207_s14, 16, %s209_s16, [#allocation6]  }
  0x1e   : > { %s1472_s13 = smov 4   ;;  %s1022_s15 = sshll.u32 %s239_s29, 5 }
  0x1f   : > { %s220_s19 = sshll.u32 %s1782_s3, 4  ;;  %s1147_s1 = sshll.u32 %s1467_s24, 5  ;;  %s221_s19 = int_to_ptr.hbm [resolvable:$true] %s220_s19 }
  0x20   : > { %1201 = dma.hbm_to_vmem [thread:$0]  (!%p1196_p2), %s221_s19, 3072, %s223_s28, [#allocation6], %s1471_s12, %s1471_s12, %s1472_s13  }
  0x21   : > { %s248_s18 = scalar_lea.hbm %s1763_s0, %s1147_s1  ;;  %s243_s14 = scalar_lea.vmem [#allocation2], %s1022_s15 }
  0x22   : > { %s251_s7 = sshll.u32 %s243_s14, 4  ;;  %s249_s16 = sshll.u32 %s248_s18, 4  ;;  %s252_s7 = int_to_ptr.vmem [resolvable:$true] %s251_s7  ;;  %s250_s16 = int_to_ptr.hbm [resolvable:$true] %s249_s16 }
  0x23   : > { %s240_s3 = scalar_lea.sflag [#allocation3], %s239_s29  ;;  %s1335_s27 = sshra.s32 %s250_s16, 4  ;;  %s1336_s27 = int_to_ptr.hbm [resolvable:$true] %s1335_s27 }
  0x24   : > { %s1337_s26 = scalar_lea.hbm %s1336_s27, 32  ;;  %p1339_p8 = pneg %p1593_p7 }
  0x25   : > { %p1338_p5 = scmp.ne.s32.totalorder %s1336_s27, %s1337_s26  ;;  %s1342_s12 = scalar_lea.hbm %s1763_s0, 64 }
  0x26   : > { %p1343_p1 = scmp.lt.s32.totalorder %s1336_s27, %s1763_s0  ;;  %p1344_p2 = scmp.lt.s32.totalorder %s1342_s12, %s1337_s26 }
  0x27   : > { %p1340_p9 = pnand %p1339_p8, %p1338_p5 }
  0x28   : > { %p1345_p3 = por %p1344_p2, %p1343_p1 }
  0x29   : > { %p1341_p10 = pneg %p1340_p9 }
  0x2b   : > { %p1346_p0 = pnand %p1345_p3, %p1341_p10 }
  0x2d   : > { %1349 = shalt.err (!%p1346_p0)
}
  0x2e   : > { %s1473_s29 = smov 128   ;;  %s1474_s13 = smov 8  }
  0x2f   : > { %1205 = dma.hbm_to_vmem [thread:$0]  (!%p1593_p7), %s250_s16, 512, %s252_s7, %s240_s3, %s1473_s29, %s1473_s29, %s1474_s13  }
  0x30   : > { %263 = sbr.rel (%p1575_p13) target bundleno = 399 (0x18f), region = 40  ;;  %s1615_s15 = sand.u32 (!%p1575_p13), 1, %s1459_s22  }
  0x31   : > { %s1026_s27 = sshll.u32 (!%p1575_p13), %s1615_s15, 5  ;;  %s266_s17 = scalar_lea.sflag (!%p1575_p13), [#allocation3], %s1615_s15 }
  0x32   : > { %s269_s18 = scalar_lea.vmem (!%p1575_p13), [#allocation2], %s1026_s27 }
  0x35   : > { %1438 = dma.done.wait (%p1560_p6), %s266_s17, 512  }
  0x36   : > { %1440 = vsyncadd (%p1560_p6), %s266_s17, 4294966784 }
  0x37   : > { %1442 = dma.done.wait (%p48_p4), [#allocation6], 3088  }
  0x38   : > { %1444 = vsyncadd (%p48_p4), [#allocation6], 4294964208  ;;  %v1629_v0 = vld [vmem:[%s269_s18 + $0x10] sm:$0xff]  ;;  %v1631_v1 = vld [vmem:[%s269_s18] sm:$0xff]  ;;  %v1475_v8 = vmov 128.0   ;;  %vm1476_vm15 = vmmov 1  }
  0x39   : > { %v1633_v2 = vld [vmem:[%s269_s18 + $0x8] sm:$0xff]  ;;  %323 = vadd.xlane.f32.xlu1 %v1629_v0  ;;  %319 = vadd.xlane.f32.xlu0 %v1631_v1  ;;  %v338_v4 = vmul.f32 %v1631_v1, %v1631_v1  ;;  %v340_v5 = vmul.f32 %v1629_v0, %v1629_v0  ;;  %v1644_v6 = vld [vmem:[%s269_s18 + $0x18] sm:$0xff]  ;;  %1265 = vrcp.f32 %v1475_v8  ;;  %s1704_s14 = scalar_lea.vmem [#allocation8], %s1026_s27  ;;  %s1172_s7 = sshll.u32 %s1536_s25, 5 }
  0x3a   : > { %v339_v3 = vmul.f32 %v1633_v2, %v1633_v2  ;;  %v341_v7 = vmul.f32 %v1644_v6, %v1644_v6  ;;  %v1163_v9 = vld [vmem:[#allocation7 + $0x78] sm:$0xff]  ;;  %v1162_v12 = vld [vmem:[#allocation7 + $0x70] sm:$0xff]  ;;  %v1161_v15 = vld [vmem:[#allocation7 + $0x68] sm:$0xff]  ;;  %s880_s19 = scalar_lea.hbm %s1768_s5, %s1172_s7  ;;  %s881_s28 = sshll.u32 %s1704_s14, 4  ;;  %s882_s28 = int_to_ptr.vmem [resolvable:$true] %s881_s28 }
  0x3b   : > { %680 = vmatpush.bf16.msra.mxu1 %v1163_v9  ;;  %v1171_v10 = vld [vmem:[#allocation7 + $0xb8] sm:$0xff]  ;;  %v1170_v14 = vld [vmem:[#allocation7 + $0xb0] sm:$0xff]  ;;  %v1169_v18 = vld [vmem:[#allocation7 + $0xa8] sm:$0xff]  ;;  %s883_s12 = sshll.u32 %s880_s19, 4  ;;  %s865_s30 = scalar_lea.sflag [#allocation4], %s1615_s15  ;;  %s884_s12 = int_to_ptr.hbm [resolvable:$true] %s883_s12 }
  0x3c   : > { %344 = vadd.xlane.f32.xlu2 %v339_v3  ;;  %807 = vmatpush.bf16.msra.mxu2 %v1171_v10  ;;  %v1155_v17 = vld [vmem:[#allocation7 + $0x38] sm:$0xff]  ;;  %v1160_v19 = vld [vmem:[#allocation7 + $0x60] sm:$0xff]  ;;  %v1154_v21 = vld [vmem:[#allocation7 + $0x30] sm:$0xff]  ;;  %s1379_s1 = sshra.s32 %s884_s12, 4  ;;  %s1385_s17 = scalar_lea.hbm %s1768_s5, 64  ;;  %s1380_s1 = int_to_ptr.hbm [resolvable:$true] %s1379_s1 }
  0x3d   : > { %590 = vmatpush.bf16.msra.mxu0 %v1155_v17  ;;  %1173 = vmatpush.bf16.msra.mxu3 %v1155_v17  ;;  %v1168_v22 = vld [vmem:[#allocation7 + $0xa0] sm:$0xff]  ;;  %v1159_v23 = vld [vmem:[#allocation7 + $0x58] sm:$0xff]  ;;  %v1153_v25 = vld [vmem:[#allocation7 + $0x28] sm:$0xff]  ;;  %s1381_s29 = scalar_lea.hbm %s1380_s1, 32  ;;  %p1386_p0 = scmp.lt.s32.totalorder %s1380_s1, %s1768_s5 }
  0x3e   : > { %v1167_v26 = vld [vmem:[#allocation7 + $0x98] sm:$0xff]  ;;  %v1158_v27 = vld [vmem:[#allocation7 + $0x50] sm:$0xff]  ;;  %v1152_v32 = vld [vmem:[#allocation7 + $0x20] sm:$0xff]  ;;  %p1382_p4 = scmp.ne.s32.totalorder %s1380_s1, %s1381_s29  ;;  %p1387_p7 = scmp.lt.s32.totalorder %s1385_s17, %s1381_s29 }
  0x3f   : > { %v1266_v11 = vpop.eup %1265  ;;  %681 = vmatpush.bf16.msra.mxu1 %v1162_v12  ;;  %v1166_v33 = vld [vmem:[#allocation7 + $0x90] sm:$0xff]  ;;  %v1157_v34 = vld [vmem:[#allocation7 + $0x48] sm:$0xff]  ;;  %v1151_v37 = vld [vmem:[#allocation7 + $0x18] sm:$0xff] }
  0x40   : > { %v328_v13 = vmul.f32 128.0, %v1266_v11  ;;  %808 = vmatpush.bf16.msra.mxu2 %v1170_v14  ;;  %vm332_vm0 = vweird.f32 %v1266_v11  ;;  %v1165_v38 = vld [vmem:[#allocation7 + $0x88] sm:$0xff]  ;;  %v1156_v39 = vld [vmem:[#allocation7 + $0x40] sm:$0xff]  ;;  %v1150_v47 = vld [vmem:[#allocation7 + $0x10] sm:$0xff]  ;;  %p1383_p6 = pnand %p1382_p4, %p1567_p11  ;;  %p1388_p5 = por %p1387_p7, %p1386_p0 }
  0x41   : > { %321 = vadd.xlane.f32.xlu0 %v1633_v2  ;;  %342 = vadd.xlane.f32.xlu1 %v338_v4  ;;  %v1164_v48 = vld [vmem:[#allocation7 + $0x80] sm:$0xff]  ;;  %v1149_v56 = vld [vmem:[#allocation7 + $0x8] sm:$0xff]  ;;  %v430_v4 = vlaneseq }
  0x42   : > { %v329_v16 = vsub.f32 1.0, %v328_v13  ;;  %591 = vmatpush.bf16.msra.mxu0 %v1154_v21  ;;  %1174 = vmatpush.bf16.msra.mxu3 %v1154_v21  ;;  %v1148_v61 = vld [vmem:[#allocation7] sm:$0xff]  ;;  %p1384_p13 = pneg %p1383_p6 }
  0x43   : > { %682 = vmatpush.bf16.msra.mxu1 %v1161_v15 }
  0x44   : > { %346 = vadd.xlane.f32.xlu2 %v340_v5  ;;  %809 = vmatpush.bf16.msra.mxu2 %v1169_v18  ;;  %v330_v20 = vmul.f32 %v1266_v11, %v329_v16  ;;  %p1389_p8 = pnand %p1388_p5, %p1384_p13 }
  0x46   : > { %v331_v24 = vadd.f32 %v1266_v11, %v330_v20  ;;  %592 = vmatpush.bf16.msra.mxu0 %v1153_v25  ;;  %1175 = vmatpush.bf16.msra.mxu3 %v1153_v25 }
  0x47   : > { %683 = vmatpush.bf16.msra.mxu1 %v1160_v19 }
  0x48   : > { %810 = vmatpush.bf16.msra.mxu2 %v1168_v22  ;;  %v333_v30 = vsel %vm332_vm0, %v1266_v11, %v331_v24  ;;  %v1665_v11 = vshrl.u32 %v430_v4, 7 }
  0x49   : > { %325 = vadd.xlane.f32.xlu0 %v1644_v6  ;;  %348 = vadd.xlane.f32.xlu1 %v341_v7 }
  0x4a   : > { %593 = vmatpush.bf16.msra.mxu0 %v1152_v32  ;;  %1176 = vmatpush.bf16.msra.mxu3 %v1152_v32  ;;  %v432_v19 = vadd.s32 8, %v1665_v11  ;;  %vm707_vm11 = vcmp.lt.s32.totalorder %v1665_v11, 7 }
  0x4b   : > { %684 = vmatpush.bf16.msra.mxu1 %v1159_v23 }
  0x4c   : > { %811 = vmatpush.bf16.msra.mxu2 %v1167_v26 }
  0x4e   : > { %594 = vmatpush.bf16.msra.mxu0 %v1151_v37  ;;  %1177 = vmatpush.bf16.msra.mxu3 %v1151_v37 }
  0x4f   : > { %685 = vmatpush.bf16.msra.mxu1 %v1158_v27  ;;  %v1262_v27 = vld [vmem:[#allocation5] ss:$0 sm:$0xff] }
  0x50   : > { %812 = vmatpush.bf16.msra.mxu2 %v1166_v33 }
  0x52   : > { %595 = vmatpush.bf16.msra.mxu0 %v1150_v47  ;;  %1178 = vmatpush.bf16.msra.mxu3 %v1150_v47  ;;  %v433_v47 = vadd.s32 16, %v1665_v11 }
  0x53   : > { %686 = vmatpush.bf16.msra.mxu1 %v1157_v34 }
  0x54   : > { %813 = vmatpush.bf16.msra.mxu2 %v1165_v38 }
  0x56   : > { %596 = vmatpush.bf16.msra.mxu0 %v1149_v56  ;;  %1179 = vmatpush.bf16.msra.mxu3 %v1149_v56 }
  0x57   : > { %687 = vmatpush.bf16.msra.mxu1 %v1156_v39 }
  0x58   : > { %814 = vmatpush.bf16.msra.mxu2 %v1164_v48 }
  0x5a   : > { %597 = vmatpush.bf16.msra.mxu0 %v1148_v61  ;;  %1180 = vmatpush.bf16.msra.mxu3 %v1148_v61 }
  0xac   : > { %v324_v28 = vpop.xlane.xlu1 %323  ;;  %v320_v29 = vpop.xlane.xlu0 %319 }
  0xad   : > { %v1649_v35 = vmul.f32 %v333_v30, %v320_v29  ;;  %v1651_v36 = vmul.f32 %v333_v30, %v324_v28  ;;  %v446_v29 = vand.u32 15, %v432_v19 }
  0xaf   : > { %v345_v31 = vpop.xlane.xlu2 %344  ;;  %v354_v42 = vmul.f32 %v1649_v35, %v1649_v35  ;;  %v356_v45 = vmul.f32 %v1651_v36, %v1651_v36  ;;  %v362_v26 = vsub.f32 %v1631_v1, %v1649_v35  ;;  %v1263_v35 = vld [vmem:[%s1765_s2] ss:$0 sm:$0xff]  ;;  %v364_v38 = vsub.f32 %v1629_v0, %v1651_v36 }
  0xb0   : > { %v351_v49 = vmul.f32 %v345_v31, %v333_v30  ;;  %v439_v36 = vand.u32 15, %v1665_v11 }
  0xb2   : > { %v496_v4 = vadd.s32 4294967295, %v439_v36 }
  0xb4   : > { %v322_v40 = vpop.xlane.xlu0 %321  ;;  %v343_v41 = vpop.xlane.xlu1 %342 }
  0xb5   : > { %v1655_v43 = vmul.f32 %v333_v30, %v322_v40  ;;  %v350_v44 = vmul.f32 %v343_v41, %v333_v30 }
  0xb7   : > { %v347_v46 = vpop.xlane.xlu2 %346  ;;  %v355_v50 = vmul.f32 %v1655_v43, %v1655_v43  ;;  %v358_v51 = vsub.f32 %v350_v44, %v354_v42  ;;  %v363_v33 = vsub.f32 %v1633_v2, %v1655_v43 }
  0xb8   : > { %v352_v52 = vmul.f32 %v347_v46, %v333_v30 }
  0xb9   : > { %v359_v53 = vsub.f32 %v351_v49, %v355_v50  ;;  %v366_v54 = vadd.f32 1e-05, %v358_v51 }
  0xba   : > { %v360_v55 = vsub.f32 %v352_v52, %v356_v45  ;;  %v713_v45 = vadd.s32 1, %v446_v29 }
  0xbb   : > { %v367_v57 = vadd.f32 1e-05, %v359_v53  ;;  %1267 = vrsqrt.f32 %v366_v54  ;;  %vm376_vm3 = vweird.f32 %v366_v54 }
  0xbc   : > { %v368_v58 = vadd.f32 1e-05, %v360_v55  ;;  %v326_v59 = vpop.xlane.xlu0 %325  ;;  %v349_v60 = vpop.xlane.xlu1 %348  ;;  %vm721_vm12 = vcmp.lt.s32.totalorder %v713_v45, 16  ;;  %v453_v55 = vand.u32 15, %v433_v47 }
  0xbd   : > { %1269 = vrsqrt.f32 %v367_v57  ;;  %v1661_v62 = vmul.f32 %v333_v30, %v326_v59  ;;  %v353_v63 = vmul.f32 %v349_v60, %v333_v30  ;;  %vm386_vm6 = vweird.f32 %v367_v57  ;;  %vm1132_vm0 = vmpackc.low %vm721_vm12, %vm1476_vm15 }
  0xbe   : > { %1271 = vrsqrt.f32 %v368_v58  ;;  %vm396_vm8 = vweird.f32 %v368_v58 }
  0xbf   : > { %v357_v3 = vmul.f32 %v1661_v62, %v1661_v62  ;;  %v365_v56 = vsub.f32 %v1644_v6, %v1661_v62  ;;  %v498_v62 = vadd.s32 4294967295, %v453_v55  ;;  %v1477_v55 = vmov 0.0  }
  0xc1   : > { %v1268_v5 = vpop.eup %1267  ;;  %v361_v7 = vsub.f32 %v353_v63, %v357_v3 }
  0xc2   : > { %v371_v8 = vmul.f32 %v1268_v5, %v366_v54  ;;  %vm377_vm1 = vweird.f32 %v1268_v5 }
  0xc3   : > { %v1270_v9 = vpop.eup %1269  ;;  %v369_v10 = vadd.f32 1e-05, %v361_v7  ;;  %vm378_vm4 = vmor %vm376_vm3, %vm377_vm1  ;;  %vm500_vm1 = vcmp.ge.s32.totalorder %v496_v4, 0  ;;  %vm502_vm3 = vcmp.ge.s32.totalorder %v498_v62, 0 }
  0xc4   : > { %v1272_v12 = vpop.eup %1271  ;;  %v381_v13 = vmul.f32 %v1270_v9, %v367_v57  ;;  %v372_v14 = vmul.f32 %v1268_v5, %v371_v8  ;;  %vm387_vm2 = vweird.f32 %v1270_v9 }
  0xc5   : > { %v391_v15 = vmul.f32 %v1272_v12, %v368_v58  ;;  %1273 = vrsqrt.f32 %v369_v10  ;;  %vm397_vm5 = vweird.f32 %v1272_v12  ;;  %vm388_vm7 = vmor %vm386_vm6, %vm387_vm2  ;;  %vm406_vm13 = vweird.f32 %v369_v10 }
  0xc6   : > { %v382_v16 = vmul.f32 %v1270_v9, %v381_v13  ;;  %v373_v17 = vmul.f32 0.5, %v372_v14  ;;  %vm398_vm9 = vmor %vm396_vm8, %vm397_vm5  ;;  %vm491_vm2 = vcmp.lt.s32.totalorder %v1665_v11, 1 }
  0xc7   : > { %v392_v18 = vmul.f32 %v1272_v12, %v391_v15  ;;  %vm1065_vm5 = vmpackc.low %vm1476_vm15, %vm502_vm3 }
  0xc8   : > { %v383_v20 = vmul.f32 0.5, %v382_v16  ;;  %v374_v21 = vsub.f32 1.5, %v373_v17 }
  0xc9   : > { %v393_v22 = vmul.f32 0.5, %v392_v18 }
  0xca   : > { %v384_v23 = vsub.f32 1.5, %v383_v20  ;;  %v375_v24 = vmul.f32 %v1268_v5, %v374_v21 }
  0xcb   : > { %v1274_v25 = vpop.eup %1273  ;;  %v394_v28 = vsub.f32 1.5, %v393_v22 }
  0xcc   : > { %v385_v30 = vmul.f32 %v1270_v9, %v384_v23  ;;  %v379_v31 = vsel %vm378_vm4, %v1268_v5, %v375_v24  ;;  %v401_v32 = vmul.f32 %v1274_v25, %v369_v10  ;;  %vm407_vm10 = vweird.f32 %v1274_v25  ;;  %vm1062_vm4 = vmpackc.low %vm1476_vm15, %vm500_vm1 }
  0xcd   : > { %v395_v34 = vmul.f32 %v1272_v12, %v394_v28  ;;  %v410_v37 = vmul.f32 %v379_v31, %v362_v26  ;;  %vm408_vm14 = vmor %vm406_vm13, %vm407_vm10 }
  0xce   : > { %v389_v39 = vsel %vm388_vm7, %v1270_v9, %v385_v30  ;;  %v402_v40 = vmul.f32 %v1274_v25, %v401_v32  ;;  %v434_v9 = vadd.s32 24, %v1665_v11  ;;  %v1264_v30 = vld [vmem:[%s1767_s4] ss:$0 sm:$0xff] }
  0xcf   : > { %v411_v41 = vmul.f32 %v389_v39, %v363_v33  ;;  %v399_v42 = vsel %vm398_vm9, %v1272_v12, %v395_v34  ;;  %v418_v44 = vmul.f32 %v1262_v27, %v410_v37 }
  0xd0   : > { %v412_v43 = vmul.f32 %v399_v42, %v364_v38  ;;  %v403_v46 = vmul.f32 0.5, %v402_v40  ;;  %v460_v16 = vand.u32 15, %v434_v9 }
  0xd1   : > { %v419_v48 = vmul.f32 %v1262_v27, %v411_v41  ;;  %v426_v49 = vadd.f32 %v1263_v35, %v418_v44 }
  0xd2   : > { %v420_v50 = vmul.f32 %v1262_v27, %v412_v43  ;;  %v404_v51 = vsub.f32 1.5, %v403_v46  ;;  %v715_v23 = vadd.s32 1, %v460_v16 }
  0xd3   : > { %v427_v52 = vadd.f32 %v1263_v35, %v419_v48  ;;  %v703_v58 = vrot.slane %v426_v49, 1  ;;  %v487_v14 = vrot.slane %v426_v49, 7 }
  0xd4   : > { %v405_v53 = vmul.f32 %v1274_v25, %v404_v51  ;;  %v428_v54 = vadd.f32 %v1263_v35, %v420_v50  ;;  %vm723_vm6 = vcmp.lt.s32.totalorder %v715_v23, 16 }
  0xd5   : > { %v613_v57 = vpack.c.bf16 %v427_v52, %v426_v49  ;;  %v704_v59 = vrot.slane %v427_v52, 1  ;;  %v488_v12 = vrot.slane %v427_v52, 7  ;;  %vm1135_vm7 = vmpackc.low %vm723_vm6, %vm1476_vm15 }
  0xd6   : > { %v409_v60 = vsel %vm408_vm14, %v1274_v25, %v405_v53  ;;  %v705_v61 = vrot.slane %v428_v54, 1  ;;  %v489_v13 = vrot.slane %v428_v54, 7 }
  0xd7   : > { %v413_v63 = vmul.f32 %v409_v60, %v365_v56  ;;  %688 = vmatmul.bf16.vlgmr.msra.gmra.mxu1 %v613_v57  ;;  %v710_v3 = vsel %vm707_vm11, %v703_v58, %v704_v59  ;;  %v494_v17 = vsel %vm491_vm2, %v487_v14, %v488_v12 }
  0xd8   : > { %v709_v5 = vsel %vm707_vm11, %v704_v59, %v705_v61  ;;  %v493_v20 = vsel %vm491_vm2, %v488_v12, %v489_v13 }
  0xd9   : > { %v421_v7 = vmul.f32 %v1262_v27, %v413_v63  ;;  %v1133_v8 = vpack.c.bf16 %v709_v5, %v710_v3 }
  0xdb   : > { %1134 = vmatmul.msk.bf16.vlgmr.msra.gmra.mxu2 %vm1132_vm0, %v1133_v8  ;;  %v429_v10 = vadd.f32 %v1263_v35, %v421_v7 }
  0xdd   : > { %v490_v15 = vrot.slane %v429_v10, 7  ;;  %v706_v24 = vrot.slane %v429_v10, 1  ;;  %v614_v25 = vpack.c.bf16 %v429_v10, %v428_v54 }
  0xdf   : > { %v495_v18 = vsel %vm491_vm2, %v490_v15, %v487_v14  ;;  %v492_v19 = vsel %vm491_vm2, %v489_v13, %v490_v15  ;;  %v708_v26 = vsel %vm707_vm11, %v705_v61, %v706_v24  ;;  %v711_v27 = vsel %vm707_vm11, %v706_v24, %v703_v58 }
  0xe0   : > { %v1063_v21 = vpack.c.bf16 %v494_v17, %v495_v18  ;;  %v1066_v22 = vpack.c.bf16 %v492_v19, %v493_v20  ;;  %v1136_v28 = vpack.c.bf16 %v711_v27, %v708_v26 }
  0xe2   : > { %1064 = vmatmul.msk.bf16.vlgmr.msra.gmra.mxu0 %vm1062_vm4, %v1063_v21  ;;  %1067 = vmatmul.msk.bf16.vlgmr.msra.gmra.mxu3 %vm1065_vm5, %v1066_v22 }
  0xe7   : > { %693 = vmatmul.bf16.gmra.mxu1 %v614_v25 }
  0xeb   : > { %1137 = vmatmul.msk.bf16.gmra.mxu2 %vm1135_vm7, %v1136_v28 }
 0x154   : > { %v689_v29 = vpop.f32.mrf.mxu1 }
 0x15c   : > { %v691_v33 = vpop.f32.mrf.mxu1 }
 0x15e   : > { %v816_v31 = vpop.f32.mrf.mxu2 }
 0x15f   : > { %v599_v32 = vpop.f32.mrf.mxu0 }
 0x160   : > { %v609_v34 = vadd.f32 %v1264_v30, %v599_v32 }
 0x162   : > { %v699_v37 = vadd.f32 %v689_v29, %v609_v34 }
 0x164   : > { %v826_v35 = vadd.f32 %v816_v31, %v699_v37  ;;  %v694_v45 = vpop.f32.mrf.mxu1 }
 0x165   : > { %v604_v38 = vpop.f32.mrf.mxu3 }
 0x166   : > { %v830_v11 = vmax.f32 %v826_v35, 0.0  ;;  %v818_v39 = vpop.f32.mrf.mxu2  ;;  %v611_v44 = vadd.f32 %v1264_v30, %v604_v38 }
 0x167   : > { %v601_v40 = vpop.f32.mrf.mxu0 }
 0x168   : > { %v856_v41 = vadd.f32 %v830_v11, %v1631_v1  ;;  %v610_v42 = vadd.f32 %v1264_v30, %v601_v40  ;;  %v701_v47 = vadd.f32 %v694_v45, %v611_v44  ;;  %vm834_vm9 = vcmp.gt.f32.partialorder %v830_v11, 0.0 }
 0x16a   : > { %860 = vst [vmem:[%s1704_s14] sm:$0xff] %v856_v41  ;;  %v700_v43 = vadd.f32 %v691_v33, %v610_v42 }
 0x16c   : > { %v827_v46 = vadd.f32 %v818_v39, %v700_v43  ;;  %v696_v54 = vpop.f32.mrf.mxu1 }
 0x16d   : > { %v606_v49 = vpop.f32.mrf.mxu3 }
 0x16e   : > { %v831_v48 = vmax.f32 %v827_v46, 0.0  ;;  %v821_v50 = vpop.f32.mrf.mxu2  ;;  %v612_v52 = vadd.f32 %v1264_v30, %v606_v49 }
 0x16f   : > { %v828_v51 = vadd.f32 %v821_v50, %v701_v47 }
 0x170   : > { %v857_v1 = vadd.f32 %v831_v48, %v1633_v2  ;;  %vm835_vm8 = vcmp.gt.f32.partialorder %v831_v48, 0.0  ;;  %v702_v57 = vadd.f32 %v696_v54, %v612_v52  ;;  %v1138_v2 = vsel %vm834_vm9, 1.0, %v1477_v55 }
 0x171   : > { %v832_v36 = vmax.f32 %v828_v51, 0.0  ;;  %v1139_v56 = vsel %vm835_vm8, 1.0, %v1477_v55 }
 0x172   : > { %861 = vst [vmem:[%s1704_s14 + $0x8] sm:$0xff] %v857_v1  ;;  %v846_v59 = vadd.f32 %v1139_v56, %v1138_v2 }
 0x173   : > { %v858_v53 = vadd.f32 %v832_v36, %v1629_v0  ;;  %vm836_vm10 = vcmp.gt.f32.partialorder %v832_v36, 0.0 }
 0x174   : > { %v1140_v61 = vsel %vm836_vm10, 1.0, %v1477_v55 }
 0x175   : > { %862 = vst [vmem:[%s1704_s14 + $0x10] sm:$0xff] %v858_v53  ;;  %v847_v63 = vadd.f32 %v1140_v61, %v846_v59 }
 0x176   : > { %v823_v58 = vpop.f32.mrf.mxu2 }
 0x177   : > { %v829_v60 = vadd.f32 %v823_v58, %v702_v57 }
 0x179   : > { %v833_v0 = vmax.f32 %v829_v60, 0.0 }
 0x17b   : > { %vm837_vm11 = vcmp.gt.f32.partialorder %v833_v0, 0.0  ;;  %v859_v3 = vadd.f32 %v833_v0, %v1644_v6 }
 0x17c   : > { %v1141_v4 = vsel %vm837_vm11, 1.0, %v1477_v55 }
 0x17d   : > { %v848_v5 = vadd.f32 %v1141_v4, %v847_v63  ;;  %863 = vst [vmem:[%s1704_s14 + $0x18] sm:$0xff] %v859_v3 }
 0x17e   : > { %1392 = shalt.err (!%p1389_p8)
}
 0x17f   : > { %s1478_s8 = smov 128   ;;  %s1479_s11 = smov 8   ;;  %v849_v6 = vrot.slane %v848_v5, 4 }
 0x180   : > { %1191 = dma.vmem_to_hbm [thread:$0]  (%p1567_p11), %s882_s28, 512, %s884_s12, %s865_s30, %s1478_s8, %s1478_s8, %s1479_s11  }
 0x181   : > { %v850_v62 = vadd.f32 %v849_v6, %v848_v5  ;;  %s895_s7 = scalar_lea.hbm %s1769_s6, %s1536_s25  ;;  %s312_s16 = scalar_lea.vmem [#allocation9], %s1615_s15 }
 0x182   : > { %s897_s26 = sshll.u32 %s312_s16, 4  ;;  %s899_s19 = sshll.u32 %s895_s7, 4  ;;  %s898_s26 = int_to_ptr.vmem [resolvable:$true] %s897_s26  ;;  %s900_s19 = int_to_ptr.hbm [resolvable:$true] %s899_s19 }
 0x183   : > { %v851_v7 = vrot.slane %v850_v62, 2  ;;  %s870_s1 = scalar_lea.sflag [#allocation10], %s1615_s15  ;;  %s1407_s29 = sshra.s32 %s900_s19, 4  ;;  %s1408_s29 = int_to_ptr.hbm [resolvable:$true] %s1407_s29 }
 0x184   : > { %s1409_s28 = scalar_lea.hbm %s1408_s29, 1  ;;  %s1413_s25 = scalar_lea.hbm %s1769_s6, 2 }
 0x185   : > { %v852_v8 = vadd.f32 %v851_v7, %v850_v62  ;;  %p1410_p9 = scmp.ne.s32.totalorder %s1408_s29, %s1409_s28  ;;  %p1414_p2 = scmp.lt.s32.totalorder %s1408_s29, %s1769_s6 }
 0x186   : > { %p1415_p3 = scmp.lt.s32.totalorder %s1413_s25, %s1409_s28 }
 0x187   : > { %v853_v9 = vrot.slane %v852_v8, 1  ;;  %p1411_p10 = pnand %p1410_p9, %p1567_p11 }
 0x188   : > { %p1416_p4 = por %p1415_p3, %p1414_p2 }
 0x189   : > { %v854_v10 = vadd.f32 %v853_v9, %v852_v8  ;;  %p1412_p1 = pneg %p1411_p10 }
 0x18b   : > { %855 = vst [vmem:[%s312_s16] sm:$0x1] %v854_v10  ;;  %p1417_p6 = pnand %p1416_p4, %p1412_p1 }
 0x18d   : > { %1420 = shalt.err (!%p1417_p6)
}
 0x18e   : > { %1192 = dma.vmem_to_hbm [thread:$0]  (%p1567_p11), %s898_s26, 16, %s900_s19, %s870_s1  }
 0x18f PF: > { %s911_s15 = sand.u32 1, %s1455_s21   ;;  %p1784_p13 = scmp.ge.s32.totalorder %s1467_s24, 2 }
 0x190   : > { %s912_s17 = scalar_lea.sflag [#allocation4], %s911_s15 }
 0x191   : > { %p1207_p0 = pnand %p1784_p13, %p1571_p12 }
 0x193   : > { %p1208_p7 = pneg %p1207_p0 }
 0x195   : > { %1446 = dma.done.wait (%p1208_p7), %s912_s17, 512  }
 0x196   : > { %1448 = vsyncadd (%p1208_p7), %s912_s17, 4294966784  ;;  %s922_s18 = scalar_lea.sflag [#allocation10], %s911_s15 }
 0x197   : > { %1450 = dma.done.wait (%p1208_p7), %s922_s18, 16  }
 0x198   : > { %1452 = vsyncadd (%p1208_p7), %s922_s18, 4294967280  ;;  %s1785_s24 = sld [smem:[#allocation15_spill]]  ;;  %s1787_s21 = smov %s1459_s22 }
 0x199   : > { %s1786_s9 = sld [smem:[#allocation16_spill]]  ;;  %s1788_s22 = smov %s1463_s23 }
 0x19e   : > { %p24_p11 = scmp.ge.s32.totalorder %s1785_s24, 4  }
 0x19f   : > { %s1789_s23 = smov %s1786_s9 }
 0x1a0   :  { %26 = sbr.rel (!%p24_p11) target bundleno = 11 (0xb), region = 112 }
 0x1a5   :  { %927 = vsyncpa [#allocation3], 1 }
 0x1a6   :  { %929 = vsyncpa [#allocation3 + $0x1], 1 }
 0x1a7   :  { %930 = vsyncpa [#allocation6], 1 }
 0x1a8   :  { %931 = vsyncpa [#allocation4], 1 }
 0x1a9   :  { %933 = vsyncpa [#allocation4 + $0x1], 1 }
 0x1aa   :  { %934 = vsyncpa [#allocation10], 1 }
 0x1ab   :  { %936 = vsyncpa [#allocation10 + $0x1], 1 }

</bundles_post_ra>
